<compile_context>
chip_gen: v7x
topology: tpu7x:2x2x1
jax: 0.10.0
libtpu: 0.0.40
codegen_flags: <defaults>
</compile_context>

<pallas_src>
import functools
import numpy as np
import jax
import jax.numpy as jnp
from jax.experimental import pallas as pl
from jax.experimental.pallas import tpu as pltpu

_ROW_BLOCK = 512  # max rows per grid step (multiple of 8); well under v7x's 64 MiB VMEM


def _round_up(v, m):
    return (v + m - 1) // m * m


def _stack_kernel(x_ref, w1_ref, c1_ref, w2_ref, c2_ref, wh_ref,
                  xhat_ref, yhat_ref, *, kernel_size_pool, len_input):
    x = x_ref[...]                                               # (TM, L) f32

    # Windowed max along time via (kernel_size-1) full-width rotate+max chains.
    # The MaxPool stride subsampling is folded into zero rows of w1 (wrapper),
    # so only window starts i = j*stride contribute; wrapped lanes are ignored.
    m = x
    for k in range(1, kernel_size_pool):
        shifted = jnp.concatenate([x[:, k:], x[:, :k]], axis=1)  # rotate-left by k
        m = jnp.maximum(m, shifted)

    # dense_hid_1 + BatchNorm1 (eval, folded) + ReLU  (pool selection folded in w1)
    h = jnp.maximum(
        jnp.dot(m, w1_ref[...], preferred_element_type=jnp.float32) + c1_ref[...], 0.0)
    # TODO(synk): Dropout is identity (eval mode); training-mode RNG mask not reproduced.

    # dense_hid_2 + BatchNorm2 (eval, folded) + ReLU
    h = jnp.maximum(
        jnp.dot(h, w2_ref[...], preferred_element_type=jnp.float32) + c2_ref[...], 0.0)

    # Fused heads: [theta_b | theta_f nearest-interpolated to horizon] in one matmul.
    theta = jnp.dot(h, wh_ref[...], preferred_element_type=jnp.float32)  # (TM, L+horizon)

    xhat_ref[...] = x - theta[:, :len_input]          # Stack residual: x - theta_b
    yhat_ref[...] = theta[:, len_input:]              # already at horizon width


@functools.partial(
    jax.jit,
    static_argnames=("kernel_size_pool", "stride_pool", "horizon", "dim_theta_f"))
def stack_forward(x, params, *, kernel_size_pool, stride_pool, horizon, dim_theta_f):
    """x: (B, C, len_input) f32 -> (x_hat (B,C,len_input), y_hat (B,1,horizon))."""
    B, C, L = x.shape
    M = B * C
    len_pool = int(np.floor((L - kernel_size_pool) / stride_pool + 1))
    H = params["w1"].shape[0]

    # --- fold BatchNorm (eval), MaxPool stride selection, nearest-interp into weights ---
    s1, t1, s2, t2 = params["s1"], params["t1"], params["s2"], params["t2"]
    w1_fold = params["w1"].T * s1                          # (len_pool, H)
    sel_rows = np.arange(len_pool) * stride_pool           # static window-start positions
    w1_sel = jnp.zeros((L, H), jnp.float32).at[sel_rows, :].set(w1_fold)
    c1 = params["b1"] * s1 + t1                            # (1, H)
    w2_fold = params["w2"].T * s2                          # (H, H)
    c2 = params["b2"] * s2 + t2                            # (1, H)
    interp_idx = np.array([(i * dim_theta_f) // horizon for i in range(horizon)])
    wf_exp = params["wf"][interp_idx, :]                   # (horizon, H) nearest-interp rows
    w_heads = jnp.concatenate([params["wb"].T, wf_exp.T], axis=1)   # (H, L + horizon)

    # --- M-tiled grid: pad rows to a multiple of the row block ---
    TM = min(_ROW_BLOCK, _round_up(M, 8))
    M_pad = _round_up(M, TM)
    x2d = x.reshape(M, L)
    if M_pad != M:
        x2d = jnp.pad(x2d, ((0, M_pad - M), (0, 0)))

    kern = functools.partial(_stack_kernel,
                             kernel_size_pool=kernel_size_pool, len_input=L)

    xhat2d, yhat2d = pl.pallas_call(
        kern,
        out_shape=(jax.ShapeDtypeStruct((M_pad, L), jnp.float32),
                   jax.ShapeDtypeStruct((M_pad, horizon), jnp.float32)),
        grid_spec=pltpu.PrefetchScalarGridSpec(
            num_scalar_prefetch=0,
            grid=(M_pad // TM,),
            in_specs=[
                pl.BlockSpec((TM, L), lambda i: (i, 0)),            # x rows (pipelined)
                pl.BlockSpec((L, H), lambda i: (0, 0)),             # w1 (VMEM-resident)
                pl.BlockSpec((1, H), lambda i: (0, 0)),             # c1
                pl.BlockSpec((H, H), lambda i: (0, 0)),             # w2
                pl.BlockSpec((1, H), lambda i: (0, 0)),             # c2
                pl.BlockSpec((H, L + horizon), lambda i: (0, 0)),   # fused heads
            ],
            out_specs=[pl.BlockSpec((TM, L), lambda i: (i, 0)),
                       pl.BlockSpec((TM, horizon), lambda i: (i, 0))],
        ),
        compiler_params=pltpu.CompilerParams(
            dimension_semantics=("parallel",),
            vmem_limit_bytes=32 * 1024 * 1024),
        input_output_aliases={0: 0},        # reuse the x buffer for x_hat
    )(x2d, w1_sel, c1, w2_fold, c2, w_heads)

    x_hat = xhat2d[:M].reshape(B, C, L)
    # Matches PyTorch: theta_f/y_hat computed for all channels, then channel 0 kept.
    y_hat = yhat2d[:M].reshape(B, C, horizon)[:, :1, :]
    return x_hat, y_hat


def _reference(x, params, *, kernel_size_pool, stride_pool, horizon, dim_theta_f):
    """Pure-JAX reference (same eval-mode semantics) for a sanity check."""
    B, C, L = x.shape
    len_pool = int(np.floor((L - kernel_size_pool) / stride_pool + 1))
    x2d = x.reshape(B * C, L)
    pooled = jnp.stack(
        [jnp.max(x2d[:, i * stride_pool:i * stride_pool + kernel_size_pool], axis=1)
         for i in range(len_pool)], axis=1)
    h = pooled @ params["w1"].T + params["b1"]
    h = jnp.maximum(h * params["s1"] + params["t1"], 0.0)
    h = h @ params["w2"].T + params["b2"]
    h = jnp.maximum(h * params["s2"] + params["t2"], 0.0)
    theta_b = h @ params["wb"].T
    theta_f = h @ params["wf"].T
    x_hat = (x2d - theta_b).reshape(B, C, L)
    idx = np.array([(i * dim_theta_f) // horizon for i in range(horizon)])
    y_hat = theta_f[:, idx].reshape(B, C, horizon)[:, :1, :]
    return x_hat, y_hat


if __name__ == "__main__":
    # Config (small, consistent with the module's dict_params)
    len_input = 16
    horizon_forecast = 8
    n_hidden = 32
    kernel_size_pool = 2
    stride_maxpool = 2
    expr_ratio_m1 = 2
    num_features = 4
    batch = 2

    dim_theta_f = int(np.ceil(horizon_forecast / expr_ratio_m1))                       # 4
    len_pool = int(np.floor((len_input - kernel_size_pool) / stride_maxpool + 1))      # 8
    eps = 1e-5

    key = jax.random.PRNGKey(0)
    ks = jax.random.split(key, 12)

    # Linear weights: PyTorch convention (out_features, in_features)
    w1 = jax.random.normal(ks[0], (n_hidden, len_pool), jnp.float32) * 0.1
    b1 = jax.random.normal(ks[1], (1, n_hidden), jnp.float32) * 0.1
    w2 = jax.random.normal(ks[2], (n_hidden, n_hidden), jnp.float32) * 0.1
    b2 = jax.random.normal(ks[3], (1, n_hidden), jnp.float32) * 0.1
    wb = jax.random.normal(ks[4], (len_input, n_hidden), jnp.float32) * 0.1
    wf = jax.random.normal(ks[5], (dim_theta_f, n_hidden), jnp.float32) * 0.1

    # BatchNorm1d (eval): fold gamma/beta/running stats into scale/shift per hidden unit
    g1 = 1.0 + 0.1 * jax.random.normal(ks[6], (1, n_hidden), jnp.float32)
    be1 = 0.1 * jax.random.normal(ks[7], (1, n_hidden), jnp.float32)
    g2 = 1.0 + 0.1 * jax.random.normal(ks[8], (1, n_hidden), jnp.float32)
    be2 = 0.1 * jax.random.normal(ks[9], (1, n_hidden), jnp.float32)
    rm1 = jnp.zeros((1, n_hidden), jnp.float32); rv1 = jnp.ones((1, n_hidden), jnp.float32)
    rm2 = jnp.zeros((1, n_hidden), jnp.float32); rv2 = jnp.ones((1, n_hidden), jnp.float32)
    s1 = g1 / jnp.sqrt(rv1 + eps); t1 = be1 - rm1 * s1
    s2 = g2 / jnp.sqrt(rv2 + eps); t2 = be2 - rm2 * s2

    params = dict(w1=w1, b1=b1, s1=s1, t1=t1,
                  w2=w2, b2=b2, s2=s2, t2=t2,
                  wb=wb, wf=wf)

    x = jax.random.normal(ks[10], (batch, num_features, len_input), jnp.float32)

    x_hat, y_hat = stack_forward(
        x, params,
        kernel_size_pool=kernel_size_pool, stride_pool=stride_maxpool,
        horizon=horizon_forecast, dim_theta_f=dim_theta_f)
    jax.block_until_ready((x_hat, y_hat))

    x_ref, y_ref = _reference(
        x, params,
        kernel_size_pool=kernel_size_pool, stride_pool=stride_maxpool,
        horizon=horizon_forecast, dim_theta_f=dim_theta_f)

    assert x_hat.shape == (batch, num_features, len_input)
    assert y_hat.shape == (batch, 1, horizon_forecast)
    np.testing.assert_allclose(np.asarray(x_hat), np.asarray(x_ref), rtol=1e-5, atol=1e-5)
    np.testing.assert_allclose(np.asarray(y_hat), np.asarray(y_ref), rtol=1e-5, atol=1e-5)

    print("KERNEL_OK")
</pallas_src>

<mosaic_0001>
module attributes {stable_mosaic.version = 11 : i64} {
  func.func @_stack_kernel(%arg0: i32, %arg1: memref<8x16xf32, #tpu.memory_space<vmem>>, %arg2: memref<16x32xf32, #tpu.memory_space<vmem>>, %arg3: memref<1x32xf32, #tpu.memory_space<vmem>>, %arg4: memref<32x32xf32, #tpu.memory_space<vmem>>, %arg5: memref<1x32xf32, #tpu.memory_space<vmem>>, %arg6: memref<32x24xf32, #tpu.memory_space<vmem>>, %arg7: memref<8x16xf32, #tpu.memory_space<vmem>>, %arg8: memref<8x8xf32, #tpu.memory_space<vmem>>) attributes {dimension_semantics = [#tpu.dimension_semantics<parallel>], iteration_bounds = array<i64: 1>, scalar_prefetch = 0 : i64, scratch_operands = 0 : i64, tpu.core_type = #tpu.core_type<tc>, window_params = [{transform_indices = @transform_0, window_bounds = array<i64: 8, 16>}, {pipeline_mode = #tpu.pipeline_mode<synchronous>, transform_indices = @transform_1, window_bounds = array<i64: 16, 32>}, {pipeline_mode = #tpu.pipeline_mode<synchronous>, transform_indices = @transform_2, window_bounds = array<i64: 1, 32>}, {pipeline_mode = #tpu.pipeline_mode<synchronous>, transform_indices = @transform_3, window_bounds = array<i64: 32, 32>}, {pipeline_mode = #tpu.pipeline_mode<synchronous>, transform_indices = @transform_4, window_bounds = array<i64: 1, 32>}, {pipeline_mode = #tpu.pipeline_mode<synchronous>, transform_indices = @transform_5, window_bounds = array<i64: 32, 24>}, {transform_indices = @transform_6, window_bounds = array<i64: 8, 16>}, {transform_indices = @transform_7, window_bounds = array<i64: 8, 8>}]} {
    %c0 = arith.constant 0 : index
    %c0_0 = arith.constant 0 : index
    %0 = vector.load %arg1[%c0, %c0_0] : memref<8x16xf32, #tpu.memory_space<vmem>>, vector<8x16xf32>
    %1 = vector.extract_strided_slice %0 {offsets = [0, 1], sizes = [8, 15], strides = [1, 1]} : vector<8x16xf32> to vector<8x15xf32>
    %2 = vector.extract_strided_slice %0 {offsets = [0, 0], sizes = [8, 1], strides = [1, 1]} : vector<8x16xf32> to vector<8x1xf32>
    %3 = tpu.concatenate %1, %2 in 1 : vector<8x15xf32>, vector<8x1xf32> -> vector<8x16xf32>
    %4 = arith.maximumf %0, %3 : vector<8x16xf32>
    %c0_1 = arith.constant 0 : index
    %c0_2 = arith.constant 0 : index
    %5 = vector.load %arg2[%c0_1, %c0_2] : memref<16x32xf32, #tpu.memory_space<vmem>>, vector<16x32xf32>
    %cst = arith.constant dense<0.000000e+00> : vector<8x32xf32>
    %6 = tpu.matmul %4, %5, %cst {dimension_numbers = #tpu.dot_dimension_numbers<[1], [0], [0], [1], [0, 0, 1, 1], [], []>} : vector<8x16xf32>, vector<16x32xf32>, vector<8x32xf32> -> vector<8x32xf32>
    %c0_3 = arith.constant 0 : index
    %c0_4 = arith.constant 0 : index
    %7 = vector.load %arg3[%c0_3, %c0_4] : memref<1x32xf32, #tpu.memory_space<vmem>>, vector<1x32xf32>
    %8 = vector.broadcast %7 : vector<1x32xf32> to vector<8x32xf32>
    %9 = arith.addf %6, %8 : vector<8x32xf32>
    %cst_5 = arith.constant 0.000000e+00 : f32
    %10 = vector.broadcast %cst_5 : f32 to vector<8x32xf32>
    %11 = arith.maximumf %9, %10 : vector<8x32xf32>
    %c0_6 = arith.constant 0 : index
    %c0_7 = arith.constant 0 : index
    %12 = vector.load %arg4[%c0_6, %c0_7] : memref<32x32xf32, #tpu.memory_space<vmem>>, vector<32x32xf32>
    %cst_8 = arith.constant dense<0.000000e+00> : vector<8x32xf32>
    %13 = tpu.matmul %11, %12, %cst_8 {dimension_numbers = #tpu.dot_dimension_numbers<[1], [0], [0], [1], [0, 0, 1, 1], [], []>} : vector<8x32xf32>, vector<32x32xf32>, vector<8x32xf32> -> vector<8x32xf32>
    %c0_9 = arith.constant 0 : index
    %c0_10 = arith.constant 0 : index
    %14 = vector.load %arg5[%c0_9, %c0_10] : memref<1x32xf32, #tpu.memory_space<vmem>>, vector<1x32xf32>
    %15 = vector.broadcast %14 : vector<1x32xf32> to vector<8x32xf32>
    %16 = arith.addf %13, %15 : vector<8x32xf32>
    %cst_11 = arith.constant 0.000000e+00 : f32
    %17 = vector.broadcast %cst_11 : f32 to vector<8x32xf32>
    %18 = arith.maximumf %16, %17 : vector<8x32xf32>
    %c0_12 = arith.constant 0 : index
    %c0_13 = arith.constant 0 : index
    %19 = vector.load %arg6[%c0_12, %c0_13] : memref<32x24xf32, #tpu.memory_space<vmem>>, vector<32x24xf32>
    %cst_14 = arith.constant dense<0.000000e+00> : vector<8x24xf32>
    %20 = tpu.matmul %18, %19, %cst_14 {dimension_numbers = #tpu.dot_dimension_numbers<[1], [0], [0], [1], [0, 0, 1, 1], [], []>} : vector<8x32xf32>, vector<32x24xf32>, vector<8x24xf32> -> vector<8x24xf32>
    %21 = vector.extract_strided_slice %20 {offsets = [0, 0], sizes = [8, 16], strides = [1, 1]} : vector<8x24xf32> to vector<8x16xf32>
    %22 = arith.subf %0, %21 : vector<8x16xf32>
    %c0_15 = arith.constant 0 : index
    %c0_16 = arith.constant 0 : index
    %23 = vector.load %arg7[%c0_15, %c0_16] : memref<8x16xf32, #tpu.memory_space<vmem>>, vector<8x16xf32>
    tpu.vector_store %arg7[%c0_15, %c0_16], %22 {strides = array<i32>} : memref<8x16xf32, #tpu.memory_space<vmem>>, vector<8x16xf32>,
    %24 = vector.extract_strided_slice %20 {offsets = [0, 16], sizes = [8, 8], strides = [1, 1]} : vector<8x24xf32> to vector<8x8xf32>
    %c0_17 = arith.constant 0 : index
    %c0_18 = arith.constant 0 : index
    %25 = vector.load %arg8[%c0_17, %c0_18] : memref<8x8xf32, #tpu.memory_space<vmem>>, vector<8x8xf32>
    tpu.vector_store %arg8[%c0_17, %c0_18], %24 {strides = array<i32>} : memref<8x8xf32, #tpu.memory_space<vmem>>, vector<8x8xf32>,
    return
  }
  func.func @transform_0(%arg0: i32) -> (i32, i32) {
    %c0_i32 = arith.constant 0 : i32
    %c0_i32_0 = arith.constant 0 : i32
    return %arg0, %c0_i32 : i32, i32
  }
  func.func @transform_1(%arg0: i32) -> (i32, i32) {
    %c0_i32 = arith.constant 0 : i32
    %c0_i32_0 = arith.constant 0 : i32
    %c0_i32_1 = arith.constant 0 : i32
    return %c0_i32, %c0_i32_0 : i32, i32
  }
  func.func @transform_2(%arg0: i32) -> (i32, i32) {
    %c0_i32 = arith.constant 0 : i32
    %c0_i32_0 = arith.constant 0 : i32
    %c0_i32_1 = arith.constant 0 : i32
    return %c0_i32, %c0_i32_0 : i32, i32
  }
  func.func @transform_3(%arg0: i32) -> (i32, i32) {
    %c0_i32 = arith.constant 0 : i32
    %c0_i32_0 = arith.constant 0 : i32
    %c0_i32_1 = arith.constant 0 : i32
    return %c0_i32, %c0_i32_0 : i32, i32
  }
  func.func @transform_4(%arg0: i32) -> (i32, i32) {
    %c0_i32 = arith.constant 0 : i32
    %c0_i32_0 = arith.constant 0 : i32
    %c0_i32_1 = arith.constant 0 : i32
    return %c0_i32, %c0_i32_0 : i32, i32
  }
  func.func @transform_5(%arg0: i32) -> (i32, i32) {
    %c0_i32 = arith.constant 0 : i32
    %c0_i32_0 = arith.constant 0 : i32
    %c0_i32_1 = arith.constant 0 : i32
    return %c0_i32, %c0_i32_0 : i32, i32
  }
  func.func @transform_6(%arg0: i32) -> (i32, i32) {
    %c0_i32 = arith.constant 0 : i32
    %c0_i32_0 = arith.constant 0 : i32
    return %arg0, %c0_i32 : i32, i32
  }
  func.func @transform_7(%arg0: i32) -> (i32, i32) {
    %c0_i32 = arith.constant 0 : i32
    %c0_i32_0 = arith.constant 0 : i32
    return %arg0, %c0_i32 : i32, i32
  }
}

</mosaic_0001>

<bundles_post_ra>
// kernel: stack_forward.1
= control target key start
LH: loop header
LB: loop body
LE: loop exit
PB: predicated region body
PF: predicated region fallthrough
CT: control target
= control target key end

     0   :  { %v367_v1 = vmov 0.0|0.0   ;;  %vm368_vm0 = vmmov 0   ;;  %v369_v4 = vmov 0.0   ;;  %s370_s30 = smov 127   ;;  %vm33_vm1 = vcmask 121856   ;;  %s469_s0 = inlined_call_operand.vmem [shape: f32[8,16], index: 0, kind: input, shape index: {}, may-alias: {0,6}]   ;;  %s470_s1 = inlined_call_operand.vmem [shape: f32[16,32], index: 1, kind: input, shape index: {}]   ;;  %s471_s3 = inlined_call_operand.vmem [shape: f32[32,32], index: 3, kind: input, shape index: {}]   ;;  %s472_s5 = inlined_call_operand.vmem [shape: f32[32,24], index: 5, kind: input, shape index: {}]   ;;  %s473_s2 = inlined_call_operand.vmem [shape: f32[1,32], index: 2, kind: input, shape index: {}]   ;;  %s474_s4 = inlined_call_operand.vmem [shape: f32[1,32], index: 4, kind: input, shape index: {}]   ;;  %s475_s6 = inlined_call_operand.vmem [shape: f32[8,16], index: 6, kind: output, shape index: {0}, may-alias: {0,6}]   ;;  %s476_s7 = inlined_call_operand.vmem [shape: f32[8,8], index: 7, kind: output, shape index: {1}]  }
   0x1   :  { %v416_v0 = vld [vmem:[%s469_s0] sm:$0xff]  ;;  %346 = vmatprep.subr.bf16.mxu0 %v367_v1  ;;  %v37_v3 = vld [vmem:[%s470_s1 + $0x8] sm:$0xff]  ;;  %321 = vmatprep.mubr.msk.f32.mxu0 %vm368_vm0, %v369_v4  ;;  %vm45_vm2 = vcmask 130048   ;;  %v122_v13 = vld [vmem:[%s471_s3 + $0x10] sm:$0xff]  ;;  %vm131_vm3 = vcmask 261120   ;;  %vm289_vm4 = vcmask 64512  }
   0x2   :  { %v36_v2 = vld [vmem:[%s470_s1] sm:$0xff]  ;;  %27 = vrot.lane.b32.xlu0 %v416_v0, %s370_s30  ;;  %349 = vmatprep.subr.bf16.mxu1 %v367_v1  ;;  %v121_v7 = vld [vmem:[%s471_s3 + $0x8] sm:$0xff]  ;;  %s371_s1 = smov 15   ;;  %v123_v14 = vld [vmem:[%s471_s3 + $0x18] sm:$0xff] }
   0x3   :  { %v347_v5 = vpack.c.bf16 %v37_v3, %v36_v2  ;;  %v120_v6 = vld [vmem:[%s471_s3] sm:$0xff]  ;;  %332 = vmatprep.mubr.msk.f32.mxu1 %vm368_vm0, %v369_v4  ;;  %v353_v15 = vpack.c.bf16 %v123_v14, %v122_v13  ;;  %v207_v17 = vld [vmem:[%s472_s5 + $0x8] sm:$0xff]  ;;  %v208_v24 = vld [vmem:[%s472_s5 + $0x10] sm:$0xff] }
   0x4   :  { %v350_v8 = vpack.c.bf16 %v121_v7, %v120_v6  ;;  %v206_v16 = vld [vmem:[%s472_s5] sm:$0xff]  ;;  %v209_v25 = vld [vmem:[%s472_s5 + $0x18] sm:$0xff] }
   0x5   :  { %348 = vmatpush3.bf16.msra.mxu0 %v347_v5  ;;  %v356_v18 = vpack.c.bf16 %v207_v17, %v206_v16  ;;  %v299_v19 = vld [vmem:[%s473_s2] ss:$0 sm:$0xff]  ;;  %v359_v26 = vpack.c.bf16 %v209_v25, %v208_v24  ;;  %s372_s2 = smov 112  }
   0x6   :  { %351 = vmatpush3.bf16.msra.mxu1 %v350_v8  ;;  %355 = vmatprep.subr.bf16.mxu0 %v367_v1  ;;  %v301_v27 = vld [vmem:[%s474_s4] ss:$0 sm:$0xff] }
   0x7   :  { %30 = vrot.lane.b32.xlu0 %v416_v0, %s371_s1  ;;  %352 = vmatprep.subr.bf16.mxu1 %v367_v1 }
   0xa   :  { %354 = vmatpush3.bf16.msra.mxu1 %v353_v15 }
  0x74   :  { %v28_v9 = vpop.permute.xlu0 %27 }
  0x79   :  { %v31_v10 = vpop.permute.xlu0 %30 }
  0x7a   :  { %v34_v11 = vsel %vm33_vm1, %v28_v9, %v31_v10 }
  0x7b   :  { %v35_v12 = vmax.f32 %v416_v0, %v34_v11 }
  0x7d   :  { %322 = vmatmul.mubr.msk.f32.vlgmr.msra.gmra.mrb[0].mxu0 %vm45_vm2, %v35_v12 }
  0x7e   :  { %343 = vmatprep.mubr.msk.f32.mxu0 %vm368_vm0, %v369_v4  ;;  %357 = vmatpush3.bf16.msra.mxu0 %v356_v18 }
  0x7f   :  { %358 = vmatprep.subr.bf16.mxu0 %v367_v1 }
  0x82   :  { %360 = vmatpush3.bf16.msra.mxu0 %v359_v26 }
 0x150   :  { %v115_v20 = vpop.f32.mrb[0].mxu0 }
 0x151   :  { %v116_v21 = vadd.f32 %v299_v19, %v115_v20  ;;  %v323_v22 = vpop.f32.mrb[1].mxu0 }
 0x153   :  { %v119_v23 = vmax.f32 %v116_v21, 0.0 }
 0x155   :  { %333 = vmatmul.mubr.msk.f32.vlgmr.msra.gmra.mrb[0].mxu1 %vm131_vm3, %v119_v23 }
 0x228   :  { %v201_v28 = vpop.f32.mrb[0].mxu1 }
 0x229   :  { %v202_v29 = vadd.f32 %v301_v27, %v201_v28  ;;  %v334_v30 = vpop.f32.mrb[1].mxu1 }
 0x22b   :  { %v205_v31 = vmax.f32 %v202_v29, 0.0 }
 0x22d   :  { %344 = vmatmul.mubr.msk.f32.vlgmr.msra.gmra.mrb[2].mxu0 %vm131_vm3, %v205_v31 }
 0x300   :  { %v279_v32 = vpop.f32.mrb[2].mxu0 }
 0x301   :  { %v283_v33 = vsub.f32 %v416_v0, %v279_v32  ;;  %286 = vrot.lane.b32.xlu1 %v279_v32, %s372_s2  ;;  %v345_v34 = vpop.f32.mrb[3].mxu0 }
 0x303   :  { %284 = vst.msk [vmem:[%s475_s6] sm:$0xff] %vm45_vm2, %v283_v33 }
 0x373   :  { %v287_v35 = vpop.permute.xlu1 %286 }
 0x374   :  { %290 = vst.msk [vmem:[%s476_s7] sm:$0xff] %vm289_vm4, %v287_v35 }

</bundles_post_ra>
